<compile_context>
chip_gen: v7x
topology: tpu7x:2x2x1
jax: 0.10.0
libtpu: 0.0.40
codegen_flags: <defaults>
</compile_context>

<pallas_src>
import numpy as np
import jax
import jax.numpy as jnp
from jax.experimental import pallas as pl
from jax.experimental.pallas import tpu as pltpu


def _round_up(x, m):
    return (x + m - 1) // m * m


def _make_kernel(num_gaussians, seg):
    def kernel(x_ref, w_ref, bias_ref, out_ref):
        # x_ref   : (TB, seg)     f32  augmented pose  [pose, 1, 0-pad]
        # w_ref   : (seg, M*seg)  bf16 (or f32) stacked augmented quadratic forms
        # bias_ref: (1, M)        f32  = 0.5*mu^T P mu - log(nll_weights)
        # out_ref : (TB, 1)       f32
        x = x_ref[...]                                            # f32, reused by VPU math
        # One streaming MXU matmul replaces the 8 per-Gaussian dots.
        y = jnp.dot(x.astype(w_ref.dtype), w_ref[...],
                    preferred_element_type=jnp.float32)           # (TB, M*seg) f32 accum
        cols = []
        for m in range(num_gaussians):                            # static, 128-lane-aligned slices
            y_m = y[:, m * seg:(m + 1) * seg]                     # (TB, seg)  vreg-aligned view
            cols.append(jnp.sum(y_m * x, axis=-1, keepdims=True))  # (TB, 1) f32 lane reduce
        # Single (TB, M) buffer -> one f32 bias add + one lane-min.
        nll = jnp.concatenate(cols, axis=-1) + bias_ref[...]      # (TB, M)
        out_ref[...] = jnp.min(nll, axis=-1, keepdims=True).astype(out_ref.dtype)

    return kernel


def max_mixture_prior_forward(pose, betas, means, precisions, nll_weights,
                              *, block_b=2048, mxu_dtype=jnp.bfloat16):
    """Pallas implementation of MaxMixturePrior.forward (use_merged=True).

    pose:        (B, P) pose vector.  betas is unused (as in merged_log_likelihood).
    means:       (M, D) GMM means,  D >= P.
    precisions:  (M, D, D) GMM precisions (inverse covariances).
    nll_weights: (1, M) mixture nll weights (buffer from __init__).
    Returns:     (B,) min-over-Gaussians negative log-likelihood terms.
    """
    del betas  # unused by merged_log_likelihood
    B, P = pose.shape
    M = means.shape[0]
    seg = _round_up(P + 1, 128)  # augmented dim (pose, 1) padded to lane multiple -> 128

    # ---- host-side constant folding (pure functions of fixed buffers) -------
    means_p = jnp.asarray(means, jnp.float32)[:, :P]                      # (M, P)
    prec_p = jnp.asarray(precisions, jnp.float32)[:, :P, :P]              # (M, P, P)
    negw = -jnp.log(jnp.asarray(nll_weights, jnp.float32)).reshape(M)     # (M,)

    pm = jnp.einsum('mij,mj->mi', prec_p, means_p)                        # P mu      (M, P)
    mp = jnp.einsum('mj,mji->mi', means_p, prec_p)                        # mu^T P    (M, P)
    mpm = jnp.einsum('mi,mi->m', means_p, pm)                             # mu^T P mu (M,)

    # Augmented quadratic forms (exact for any, even asymmetric, P_m):
    #   x_aug^T A_m x_aug = 0.5 * (x - mu_m)^T P_m (x - mu_m)  (constant part in bias)
    A = jnp.zeros((M, seg, seg), jnp.float32)
    A = A.at[:, :P, :P].set(0.5 * prec_p)
    A = A.at[:, :P, P].set(-0.5 * pm)
    A = A.at[:, P, :P].set(-0.5 * mp)
    # Stack along output lanes: W[:, m*seg:(m+1)*seg] = A[m]
    W = jnp.transpose(A, (1, 0, 2)).reshape(seg, M * seg).astype(mxu_dtype)
    # Large constants stay in exact f32, never rounded to bf16.
    bias = (0.5 * mpm + negw).reshape(1, M).astype(jnp.float32)

    # ---- batch tiling --------------------------------------------------------
    # Multiple of 8 sublanes; cap at ceil(B/2) so there are >= 2 grid steps
    # (v7x megacore gets both TensorCores busy), but never below 8.
    tb = min(block_b, _round_up(max(1, -(-B // 2)), 8))
    tb = _round_up(tb, 8)
    b_pad = _round_up(B, tb)

    # Augmented, lane-padded pose: [pose, 1, 0...]; padded batch rows stay all-zero
    # (their result is bias-only and gets sliced off).
    pose_f = jnp.asarray(pose, jnp.float32)
    x_aug = jnp.zeros((b_pad, seg), jnp.float32)
    x_aug = x_aug.at[:B, :P].set(pose_f)
    x_aug = x_aug.at[:B, P].set(1.0)

    grid = (b_pad // tb,)

    out = pl.pallas_call(
        _make_kernel(M, seg),
        out_shape=jax.ShapeDtypeStruct((b_pad, 1), jnp.float32),
        grid_spec=pltpu.PrefetchScalarGridSpec(
            num_scalar_prefetch=0,
            grid=grid,
            in_specs=[
                pl.BlockSpec((tb, seg), lambda i: (i, 0)),        # pose tile (pipelined)
                pl.BlockSpec((seg, M * seg), lambda i: (0, 0)),   # stacked W (VMEM-resident)
                pl.BlockSpec((1, M), lambda i: (0, 0)),           # f32 bias  (VMEM-resident)
            ],
            out_specs=pl.BlockSpec((tb, 1), lambda i: (i, 0)),
        ),
        compiler_params=pltpu.CompilerParams(
            dimension_semantics=("parallel",),   # megacore sharding on v7x; neutral elsewhere
            vmem_limit_bytes=48 * 1024 * 1024,   # allows tb=2048 on v5e's 16 MiB scoped default
        ),
    )(x_aug, W, bias)

    return out[:B, 0].astype(pose.dtype)


def _build_gmm(key, num_gaussians=8, dim=69):
    """Deterministic stand-in for the gmm_08.pkl buffers (mirrors __init__)."""
    k1, k2, k3 = jax.random.split(key, 3)
    means = 0.1 * jax.random.normal(k1, (num_gaussians, dim), dtype=jnp.float32)
    a = 0.3 * jax.random.normal(k2, (num_gaussians, dim, dim), dtype=jnp.float32)
    covs = jnp.einsum("mij,mkj->mik", a, a) / dim + 0.5 * jnp.eye(dim, dtype=jnp.float32)
    weights = jax.nn.softmax(jax.random.normal(k3, (num_gaussians,), dtype=jnp.float32))

    # Host-side buffer setup exactly as in MaxMixturePrior.__init__ (NumPy).
    covs_np = np.asarray(covs, dtype=np.float64)
    weights_np = np.asarray(weights, dtype=np.float64)
    precisions = np.stack([np.linalg.inv(c) for c in covs_np]).astype(np.float32)
    sqrdets = np.array([np.sqrt(np.linalg.det(c)) for c in covs_np])
    const = (2.0 * np.pi) ** (dim / 2.0)
    nll_weights = (weights_np / (const * (sqrdets / sqrdets.min()))).astype(np.float32)
    nll_weights = nll_weights[None, :]  # (1, M)
    return np.asarray(means, np.float32), precisions, nll_weights


def _reference_np(pose, means, precisions, nll_weights):
    """float64 NumPy reference of merged_log_likelihood."""
    pose64 = np.asarray(pose, np.float64)
    means64 = np.asarray(means, np.float64)
    prec64 = np.asarray(precisions, np.float64)
    nllw64 = np.asarray(nll_weights, np.float64)
    p = pose64.shape[1]
    diff = pose64[:, None, :] - means64[None, :, :p]                    # (B, M, D)
    prod = np.einsum("mij,bmj->bmi", prec64[:, :p, :p], diff)           # (B, M, D)
    quad = np.sum(prod * diff, axis=-1)                                 # (B, M)
    nll = 0.5 * quad - np.log(nllw64)                                   # (B, M)
    return nll.min(axis=1)


if __name__ == "__main__":
    key = jax.random.PRNGKey(0)
    k_gmm, k_pose, k_betas = jax.random.split(key, 3)

    NUM_GAUSSIANS, POSE_DIM, BATCH = 8, 69, 2
    means, precisions, nll_weights = _build_gmm(k_gmm, NUM_GAUSSIANS, POSE_DIM)

    pose = 0.5 * jax.random.normal(k_pose, (BATCH, POSE_DIM), dtype=jnp.float32)
    betas = jax.random.normal(k_betas, (BATCH, 10), dtype=jnp.float32)  # unused by merged path

    out = max_mixture_prior_forward(pose, betas, means, precisions, nll_weights)
    out = jax.block_until_ready(out)
    assert out.shape == (BATCH,)

    ref = _reference_np(np.asarray(pose), means, precisions, nll_weights)
    # bf16 MXU operands (quadratic part only; -log(w) bias is exact f32):
    # tolerance set accordingly.
    np.testing.assert_allclose(np.asarray(out, np.float64), ref, rtol=1e-2, atol=1e-2)

    print("KERNEL_OK")
</pallas_src>

<mosaic_0001>
module attributes {stable_mosaic.version = 11 : i64} {
  func.func @kernel(%arg0: i32, %arg1: memref<8x128xf32, #tpu.memory_space<vmem>>, %arg2: memref<128x1024xbf16, #tpu.memory_space<vmem>>, %arg3: memref<1x8xf32, #tpu.memory_space<vmem>>, %arg4: memref<8x1xf32, #tpu.memory_space<vmem>>) attributes {dimension_semantics = [#tpu.dimension_semantics<parallel>], iteration_bounds = array<i64: 1>, scalar_prefetch = 0 : i64, scratch_operands = 0 : i64, tpu.core_type = #tpu.core_type<tc>, window_params = [{transform_indices = @transform_0, window_bounds = array<i64: 8, 128>}, {pipeline_mode = #tpu.pipeline_mode<synchronous>, transform_indices = @transform_1, window_bounds = array<i64: 128, 1024>}, {pipeline_mode = #tpu.pipeline_mode<synchronous>, transform_indices = @transform_2, window_bounds = array<i64: 1, 8>}, {transform_indices = @transform_3, window_bounds = array<i64: 8, 1>}]} {
    %c0 = arith.constant 0 : index
    %c0_0 = arith.constant 0 : index
    %0 = vector.load %arg1[%c0, %c0_0] : memref<8x128xf32, #tpu.memory_space<vmem>>, vector<8x128xf32>
    %1 = arith.truncf %0 : vector<8x128xf32> to vector<8x128xbf16>
    %c0_1 = arith.constant 0 : index
    %c0_2 = arith.constant 0 : index
    %2 = vector.load %arg2[%c0_1, %c0_2] : memref<128x1024xbf16, #tpu.memory_space<vmem>>, vector<128x1024xbf16>
    %cst = arith.constant dense<0.000000e+00> : vector<8x1024xf32>
    %3 = tpu.matmul %1, %2, %cst {dimension_numbers = #tpu.dot_dimension_numbers<[1], [0], [0], [1], [0, 0, 1, 1], [], []>} : vector<8x128xbf16>, vector<128x1024xbf16>, vector<8x1024xf32> -> vector<8x1024xf32>
    %4 = vector.extract_strided_slice %3 {offsets = [0, 0], sizes = [8, 128], strides = [1, 1]} : vector<8x1024xf32> to vector<8x128xf32>
    %5 = arith.mulf %4, %0 : vector<8x128xf32>
    %cst_3 = arith.constant dense<0.000000e+00> : vector<8xf32>
    %6 = vector.multi_reduction <add>, %5, %cst_3 [1] : vector<8x128xf32> to vector<8xf32>
    %7 = vector.shape_cast %6 : vector<8xf32> to vector<8x1xf32>
    %8 = vector.extract_strided_slice %3 {offsets = [0, 128], sizes = [8, 128], strides = [1, 1]} : vector<8x1024xf32> to vector<8x128xf32>
    %9 = arith.mulf %8, %0 : vector<8x128xf32>
    %cst_4 = arith.constant dense<0.000000e+00> : vector<8xf32>
    %10 = vector.multi_reduction <add>, %9, %cst_4 [1] : vector<8x128xf32> to vector<8xf32>
    %11 = vector.shape_cast %10 : vector<8xf32> to vector<8x1xf32>
    %12 = vector.extract_strided_slice %3 {offsets = [0, 256], sizes = [8, 128], strides = [1, 1]} : vector<8x1024xf32> to vector<8x128xf32>
    %13 = arith.mulf %12, %0 : vector<8x128xf32>
    %cst_5 = arith.constant dense<0.000000e+00> : vector<8xf32>
    %14 = vector.multi_reduction <add>, %13, %cst_5 [1] : vector<8x128xf32> to vector<8xf32>
    %15 = vector.shape_cast %14 : vector<8xf32> to vector<8x1xf32>
    %16 = vector.extract_strided_slice %3 {offsets = [0, 384], sizes = [8, 128], strides = [1, 1]} : vector<8x1024xf32> to vector<8x128xf32>
    %17 = arith.mulf %16, %0 : vector<8x128xf32>
    %cst_6 = arith.constant dense<0.000000e+00> : vector<8xf32>
    %18 = vector.multi_reduction <add>, %17, %cst_6 [1] : vector<8x128xf32> to vector<8xf32>
    %19 = vector.shape_cast %18 : vector<8xf32> to vector<8x1xf32>
    %20 = vector.extract_strided_slice %3 {offsets = [0, 512], sizes = [8, 128], strides = [1, 1]} : vector<8x1024xf32> to vector<8x128xf32>
    %21 = arith.mulf %20, %0 : vector<8x128xf32>
    %cst_7 = arith.constant dense<0.000000e+00> : vector<8xf32>
    %22 = vector.multi_reduction <add>, %21, %cst_7 [1] : vector<8x128xf32> to vector<8xf32>
    %23 = vector.shape_cast %22 : vector<8xf32> to vector<8x1xf32>
    %24 = vector.extract_strided_slice %3 {offsets = [0, 640], sizes = [8, 128], strides = [1, 1]} : vector<8x1024xf32> to vector<8x128xf32>
    %25 = arith.mulf %24, %0 : vector<8x128xf32>
    %cst_8 = arith.constant dense<0.000000e+00> : vector<8xf32>
    %26 = vector.multi_reduction <add>, %25, %cst_8 [1] : vector<8x128xf32> to vector<8xf32>
    %27 = vector.shape_cast %26 : vector<8xf32> to vector<8x1xf32>
    %28 = vector.extract_strided_slice %3 {offsets = [0, 768], sizes = [8, 128], strides = [1, 1]} : vector<8x1024xf32> to vector<8x128xf32>
    %29 = arith.mulf %28, %0 : vector<8x128xf32>
    %cst_9 = arith.constant dense<0.000000e+00> : vector<8xf32>
    %30 = vector.multi_reduction <add>, %29, %cst_9 [1] : vector<8x128xf32> to vector<8xf32>
    %31 = vector.shape_cast %30 : vector<8xf32> to vector<8x1xf32>
    %32 = vector.extract_strided_slice %3 {offsets = [0, 896], sizes = [8, 128], strides = [1, 1]} : vector<8x1024xf32> to vector<8x128xf32>
    %33 = arith.mulf %32, %0 : vector<8x128xf32>
    %cst_10 = arith.constant dense<0.000000e+00> : vector<8xf32>
    %34 = vector.multi_reduction <add>, %33, %cst_10 [1] : vector<8x128xf32> to vector<8xf32>
    %35 = vector.shape_cast %34 : vector<8xf32> to vector<8x1xf32>
    %36 = tpu.concatenate %7, %11, %15, %19, %23, %27, %31, %35 in 1 : vector<8x1xf32>, vector<8x1xf32>, vector<8x1xf32>, vector<8x1xf32>, vector<8x1xf32>, vector<8x1xf32>, vector<8x1xf32>, vector<8x1xf32> -> vector<8x8xf32>
    %c0_11 = arith.constant 0 : index
    %c0_12 = arith.constant 0 : index
    %37 = vector.load %arg3[%c0_11, %c0_12] : memref<1x8xf32, #tpu.memory_space<vmem>>, vector<1x8xf32>
    %38 = vector.broadcast %37 : vector<1x8xf32> to vector<8x8xf32>
    %39 = arith.addf %36, %38 : vector<8x8xf32>
    %cst_13 = arith.constant dense<0x7F800000> : vector<8xf32>
    %40 = vector.multi_reduction <minimumf>, %39, %cst_13 [1] : vector<8x8xf32> to vector<8xf32>
    %41 = vector.shape_cast %40 : vector<8xf32> to vector<8x1xf32>
    %c0_14 = arith.constant 0 : index
    %c0_15 = arith.constant 0 : index
    %42 = vector.load %arg4[%c0_14, %c0_15] : memref<8x1xf32, #tpu.memory_space<vmem>>, vector<8x1xf32>
    tpu.vector_store %arg4[%c0_14, %c0_15], %41 {strides = array<i32>} : memref<8x1xf32, #tpu.memory_space<vmem>>, vector<8x1xf32>,
    return
  }
  func.func @transform_0(%arg0: i32) -> (i32, i32) {
    %c0_i32 = arith.constant 0 : i32
    %c0_i32_0 = arith.constant 0 : i32
    return %arg0, %c0_i32 : i32, i32
  }
  func.func @transform_1(%arg0: i32) -> (i32, i32) {
    %c0_i32 = arith.constant 0 : i32
    %c0_i32_0 = arith.constant 0 : i32
    %c0_i32_1 = arith.constant 0 : i32
    return %c0_i32, %c0_i32_0 : i32, i32
  }
  func.func @transform_2(%arg0: i32) -> (i32, i32) {
    %c0_i32 = arith.constant 0 : i32
    %c0_i32_0 = arith.constant 0 : i32
    %c0_i32_1 = arith.constant 0 : i32
    return %c0_i32, %c0_i32_0 : i32, i32
  }
  func.func @transform_3(%arg0: i32) -> (i32, i32) {
    %c0_i32 = arith.constant 0 : i32
    %c0_i32_0 = arith.constant 0 : i32
    return %arg0, %c0_i32 : i32, i32
  }
}

</mosaic_0001>

<bundles_post_ra>
// kernel: tpu_custom_call.1
= control target key start
LH: loop header
LB: loop body
LE: loop exit
PB: predicated region body
PF: predicated region fallthrough
CT: control target
= control target key end

     0   :  { %8 = vsyncpa [#allocation3], 0  ;;  %s852_s0 = inlined_call_operand.hbm [shape: f32[8,128], index: 0, kind: input, shape index: {}]   ;;  %s853_s1 = inlined_call_operand.hbm [shape: bf16[128,1024], index: 1, kind: input, shape index: {}]   ;;  %s854_s2 = inlined_call_operand.vmem [shape: f32[1,8], index: 2, kind: input, shape index: {}]   ;;  %s855_s3 = inlined_call_operand.vmem [shape: f32[8,1], index: 3, kind: output, shape index: {}]  }
   0x1   :  { %9 = vsyncpa [#allocation5], 0  ;;  %s766_s12 = smov [#allocation2]   ;;  %s767_s14 = smov [#allocation4]  }
   0x2   :  { %s16_s13 = sshll.u32 %s766_s12, 4  ;;  %s25_s15 = sshll.u32 %s767_s14, 4  ;;  %s17_s13 = int_to_ptr.vmem [resolvable:$true] %s16_s13  ;;  %s791_s15 = int_to_ptr.vmem [resolvable:$true] %s25_s15 }
   0x3   :  { %s718_s18 = scalar_lea.hbm %s852_s0, 128 }
   0x4   :  { %p719_p0 = scmp.ne.s32.totalorder %s852_s0, %s718_s18  ;;  %p722_p1 = scmp.lt.u32.totalorder %s718_s18, %s852_s0 }
   0x6   :  { %p724_p2 = pnand %p722_p1, %p719_p0 }
   0x8   :  { %727 = shalt.err (!%p724_p2)
}
   0x9   :  { %s728_s23 = scalar_lea.vmem %s17_s13, 128  ;;  %p733_p4 = scmp.lt.s32.totalorder %s17_s13, %s17_s13 }
   0xa   :  { %p729_p3 = scmp.ne.s32.totalorder %s17_s13, %s728_s23  ;;  %p734_p5 = scmp.lt.s32.totalorder %s728_s23, %s728_s23 }
   0xc   :  { %p735_p6 = por %p734_p5, %p733_p4 }
   0xe   :  { %p736_p7 = pnand %p735_p6, %p729_p3 }
  0x10   :  { %739 = shalt.err (!%p736_p7)
}
  0x11   :  { %19 = dma.hbm_to_vmem [thread:$0]  %s852_s0, 128, %s17_s13, [#allocation3]  }
  0x12   :  { %s740_s28 = scalar_lea.hbm %s853_s1, 8192 }
  0x13   :  { %p741_p8 = scmp.ne.s32.totalorder %s853_s1, %s740_s28  ;;  %p744_p9 = scmp.lt.u32.totalorder %s740_s28, %s853_s1 }
  0x15   :  { %p746_p10 = pnand %p744_p9, %p741_p8 }
  0x17   :  { %749 = shalt.err (!%p746_p10)
}
  0x18   :  { %s750_s6 = scalar_lea.vmem %s791_s15, 8192  ;;  %p755_p12 = scmp.lt.s32.totalorder %s791_s15, %s791_s15 }
  0x19   :  { %p751_p11 = scmp.ne.s32.totalorder %s791_s15, %s750_s6  ;;  %p756_p13 = scmp.lt.s32.totalorder %s750_s6, %s750_s6 }
  0x1b   :  { %p757_p0 = por %p756_p13, %p755_p12 }
  0x1d   :  { %p758_p1 = pnand %p757_p0, %p751_p11 }
  0x1f   :  { %761 = shalt.err (!%p758_p1)
}
  0x20   :  { %s768_s0 = smov 512   ;;  %s769_s7 = smov 32  }
  0x21   :  { %31 = dma.hbm_to_vmem [thread:$0]  %s853_s1, 8192, %s791_s15, [#allocation5], %s768_s0, %s768_s0, %s769_s7  }
  0x22   :  { %762 = dma.done.wait [#allocation3], 128  }
  0x23   :  { %763 = vsyncadd [#allocation3], 4294967168 }
  0x24   :  { %764 = dma.done.wait [#allocation5], 8192  }
  0x25   :  { %765 = vsyncadd [#allocation5], 4294959104  ;;  %v770_v0 = vmov 0   ;;  %v43_v1 = vld [vmem:[#allocation4] sm:$0xff]  ;;  %v44_v3 = vld [vmem:[#allocation4 + $0x8] sm:$0xff]  ;;  %vm615_vm0 = vcmask 7168  }
  0x26   :  { %459 = vmatprep.mubr.bf16.mxu0 %v770_v0  ;;  %500 = vmatprep.mubr.bf16.mxu1 %v770_v0  ;;  %v47_v2 = vld [vmem:[#allocation4 + $0x20] sm:$0xff]  ;;  %v48_v6 = vld [vmem:[#allocation4 + $0x28] sm:$0xff]  ;;  %v45_v63 = vld [vmem:[#allocation4 + $0x10] sm:$0xff]  ;;  %vm617_vm1 = vcmask 15360   ;;  %vm619_vm2 = vcmask 23552   ;;  %vm621_vm3 = vcmask 31744  }
  0x27   :  { %v649_v4 = vcombine.high %v43_v1, %v47_v2  ;;  %v648_v5 = vcombine.low %v43_v1, %v47_v2  ;;  %v51_v7 = vld [vmem:[#allocation4 + $0x40] sm:$0xff]  ;;  %v651_v9 = vcombine.high %v44_v3, %v48_v6  ;;  %v650_v10 = vcombine.low %v44_v3, %v48_v6  ;;  %v52_v12 = vld [vmem:[#allocation4 + $0x48] sm:$0xff]  ;;  %v49_v1 = vld [vmem:[#allocation4 + $0x30] sm:$0xff] }
  0x28   :  { %v55_v8 = vld [vmem:[#allocation4 + $0x60] sm:$0xff]  ;;  %v56_v13 = vld [vmem:[#allocation4 + $0x68] sm:$0xff]  ;;  %v46_v2 = vld [vmem:[#allocation4 + $0x18] sm:$0xff]  ;;  %vm623_vm4 = vcmask 39936   ;;  %vm625_vm5 = vcmask 48128   ;;  %vm627_vm6 = vcmask 56320  }
  0x29   :  { %v657_v11 = vcombine.high %v51_v7, %v55_v8  ;;  %v59_v14 = vld [vmem:[#allocation4 + $0x80] sm:$0xff]  ;;  %427 = vmatprep.subr.bf16.mxu0 %v649_v4  ;;  %v659_v15 = vcombine.high %v52_v12, %v56_v13  ;;  %v60_v17 = vld [vmem:[#allocation4 + $0x88] sm:$0xff]  ;;  %468 = vmatprep.subr.bf16.mxu1 %v651_v9  ;;  %v656_v19 = vcombine.low %v51_v7, %v55_v8  ;;  %v50_v3 = vld [vmem:[#allocation4 + $0x38] sm:$0xff]  ;;  %vm637_vm7 = vcmask 64512  }
  0x2a   :  { %v63_v16 = vld [vmem:[#allocation4 + $0xa0] sm:$0xff]  ;;  %v64_v18 = vld [vmem:[#allocation4 + $0xa8] sm:$0xff]  ;;  %428 = vmatpush1.bf16.msra.mxu0 %v648_v5  ;;  %469 = vmatpush1.bf16.msra.mxu1 %v650_v10  ;;  %v658_v20 = vcombine.low %v52_v12, %v56_v13  ;;  %v824_v5 = vld [vmem:[#allocation2] sm:$0xff]  ;;  %v653_v7 = vcombine.high %v45_v63, %v49_v1  ;;  %v655_v8 = vcombine.high %v46_v2, %v50_v3 }
  0x2b   :  { %429 = vmatprep.subr.bf16.mxu0 %v657_v11  ;;  %v665_v21 = vcombine.high %v59_v14, %v63_v16  ;;  %470 = vmatprep.subr.bf16.mxu1 %v659_v15  ;;  %v667_v22 = vcombine.high %v60_v17, %v64_v18  ;;  %v67_v23 = vld [vmem:[#allocation4 + $0xc0] sm:$0xff]  ;;  %v68_v25 = vld [vmem:[#allocation4 + $0xc8] sm:$0xff]  ;;  %v664_v27 = vcombine.low %v59_v14, %v63_v16  ;;  %v53_v9 = vld [vmem:[#allocation4 + $0x50] sm:$0xff] }
  0x2c   :  { %v71_v24 = vld [vmem:[#allocation4 + $0xe0] sm:$0xff]  ;;  %v72_v26 = vld [vmem:[#allocation4 + $0xe8] sm:$0xff]  ;;  %v666_v28 = vcombine.low %v60_v17, %v64_v18  ;;  %v57_v10 = vld [vmem:[#allocation4 + $0x70] sm:$0xff]  ;;  %v828_v11 = vpack.c.bf16 %v824_v5, %v824_v5  ;;  %v652_v14 = vcombine.low %v45_v63, %v49_v1  ;;  %v654_v15 = vcombine.low %v46_v2, %v50_v3 }
  0x2d   :  { %v673_v29 = vcombine.high %v67_v23, %v71_v24  ;;  %v675_v30 = vcombine.high %v68_v25, %v72_v26  ;;  %v75_v31 = vld [vmem:[#allocation4 + $0x100] sm:$0xff]  ;;  %v76_v33 = vld [vmem:[#allocation4 + $0x108] sm:$0xff]  ;;  %v672_v35 = vcombine.low %v67_v23, %v71_v24  ;;  %v674_v36 = vcombine.low %v68_v25, %v72_v26  ;;  %v54_v12 = vld [vmem:[#allocation4 + $0x58] sm:$0xff] }
  0x2e   :  { %430 = vmatpush1.bf16.msra.mxu0 %v656_v19  ;;  %471 = vmatpush1.bf16.msra.mxu1 %v658_v20  ;;  %v79_v32 = vld [vmem:[#allocation4 + $0x120] sm:$0xff]  ;;  %v80_v34 = vld [vmem:[#allocation4 + $0x128] sm:$0xff]  ;;  %v58_v13 = vld [vmem:[#allocation4 + $0x78] sm:$0xff]  ;;  %v661_v16 = vcombine.high %v53_v9, %v57_v10 }
  0x2f   :  { %431 = vmatprep.subr.bf16.mxu0 %v665_v21  ;;  %472 = vmatprep.subr.bf16.mxu1 %v667_v22  ;;  %v681_v37 = vcombine.high %v75_v31, %v79_v32  ;;  %v683_v38 = vcombine.high %v76_v33, %v80_v34  ;;  %v83_v39 = vld [vmem:[#allocation4 + $0x140] sm:$0xff]  ;;  %v84_v41 = vld [vmem:[#allocation4 + $0x148] sm:$0xff]  ;;  %v680_v43 = vcombine.low %v75_v31, %v79_v32  ;;  %v61_v18 = vld [vmem:[#allocation4 + $0x90] sm:$0xff] }
  0x30   :  { %v87_v40 = vld [vmem:[#allocation4 + $0x160] sm:$0xff]  ;;  %v88_v42 = vld [vmem:[#allocation4 + $0x168] sm:$0xff]  ;;  %v682_v44 = vcombine.low %v76_v33, %v80_v34  ;;  %v663_v17 = vcombine.high %v54_v12, %v58_v13  ;;  %v65_v19 = vld [vmem:[#allocation4 + $0xb0] sm:$0xff]  ;;  %v660_v22 = vcombine.low %v53_v9, %v57_v10  ;;  %v662_v23 = vcombine.low %v54_v12, %v58_v13 }
  0x31   :  { %v689_v45 = vcombine.high %v83_v39, %v87_v40  ;;  %v691_v46 = vcombine.high %v84_v41, %v88_v42  ;;  %v91_v47 = vld [vmem:[#allocation4 + $0x180] sm:$0xff]  ;;  %v92_v49 = vld [vmem:[#allocation4 + $0x188] sm:$0xff]  ;;  %v688_v51 = vcombine.low %v83_v39, %v87_v40  ;;  %v690_v52 = vcombine.low %v84_v41, %v88_v42  ;;  %v62_v20 = vld [vmem:[#allocation4 + $0x98] sm:$0xff] }
  0x32   :  { %432 = vmatpush1.bf16.msra.mxu0 %v664_v27  ;;  %473 = vmatpush1.bf16.msra.mxu1 %v666_v28  ;;  %v95_v48 = vld [vmem:[#allocation4 + $0x1a0] sm:$0xff]  ;;  %v96_v50 = vld [vmem:[#allocation4 + $0x1a8] sm:$0xff]  ;;  %v66_v21 = vld [vmem:[#allocation4 + $0xb8] sm:$0xff]  ;;  %v669_v24 = vcombine.high %v61_v18, %v65_v19 }
  0x33   :  { %433 = vmatprep.subr.bf16.mxu0 %v673_v29  ;;  %474 = vmatprep.subr.bf16.mxu1 %v675_v30  ;;  %v697_v53 = vcombine.high %v91_v47, %v95_v48  ;;  %v699_v54 = vcombine.high %v92_v49, %v96_v50  ;;  %v99_v55 = vld [vmem:[#allocation4 + $0x1c0] sm:$0xff]  ;;  %v100_v57 = vld [vmem:[#allocation4 + $0x1c8] sm:$0xff]  ;;  %v696_v59 = vcombine.low %v91_v47, %v95_v48  ;;  %v69_v26 = vld [vmem:[#allocation4 + $0xd0] sm:$0xff] }
  0x34   :  { %v103_v56 = vld [vmem:[#allocation4 + $0x1e0] sm:$0xff]  ;;  %v104_v58 = vld [vmem:[#allocation4 + $0x1e8] sm:$0xff]  ;;  %v698_v60 = vcombine.low %v92_v49, %v96_v50  ;;  %v671_v25 = vcombine.high %v62_v20, %v66_v21  ;;  %v73_v27 = vld [vmem:[#allocation4 + $0xf0] sm:$0xff]  ;;  %v668_v30 = vcombine.low %v61_v18, %v65_v19  ;;  %v670_v31 = vcombine.low %v62_v20, %v66_v21 }
  0x35   :  { %v705_v61 = vcombine.high %v99_v55, %v103_v56  ;;  %v707_v62 = vcombine.high %v100_v57, %v104_v58  ;;  %v704_v4 = vcombine.low %v99_v55, %v103_v56  ;;  %v706_v6 = vcombine.low %v100_v57, %v104_v58  ;;  %v70_v28 = vld [vmem:[#allocation4 + $0xd8] sm:$0xff]  ;;  %v77_v34 = vld [vmem:[#allocation4 + $0x110] sm:$0xff] }
  0x36   :  { %434 = vmatpush1.bf16.msra.mxu0 %v672_v35  ;;  %475 = vmatpush1.bf16.msra.mxu1 %v674_v36  ;;  %v74_v29 = vld [vmem:[#allocation4 + $0xf8] sm:$0xff]  ;;  %v677_v32 = vcombine.high %v69_v26, %v73_v27  ;;  %v81_v35 = vld [vmem:[#allocation4 + $0x130] sm:$0xff] }
  0x37   :  { %435 = vmatprep.subr.bf16.mxu0 %v681_v37  ;;  %476 = vmatprep.subr.bf16.mxu1 %v683_v38  ;;  %v679_v33 = vcombine.high %v70_v28, %v74_v29  ;;  %v78_v36 = vld [vmem:[#allocation4 + $0x118] sm:$0xff]  ;;  %v676_v38 = vcombine.low %v69_v26, %v73_v27  ;;  %v678_v39 = vcombine.low %v70_v28, %v74_v29  ;;  %v85_v41 = vld [vmem:[#allocation4 + $0x150] sm:$0xff] }
  0x38   :  { %v82_v37 = vld [vmem:[#allocation4 + $0x138] sm:$0xff]  ;;  %v685_v40 = vcombine.high %v77_v34, %v81_v35  ;;  %v89_v42 = vld [vmem:[#allocation4 + $0x170] sm:$0xff] }
  0x39   :  { %v693_v47 = vcombine.high %v85_v41, %v89_v42  ;;  %v93_v49 = vld [vmem:[#allocation4 + $0x190] sm:$0xff] }
  0x3a   :  { %436 = vmatpush1.bf16.msra.mxu0 %v680_v43  ;;  %477 = vmatpush1.bf16.msra.mxu1 %v682_v44  ;;  %v86_v43 = vld [vmem:[#allocation4 + $0x158] sm:$0xff]  ;;  %v97_v50 = vld [vmem:[#allocation4 + $0x1b0] sm:$0xff] }
  0x3b   :  { %437 = vmatprep.subr.bf16.mxu0 %v689_v45  ;;  %478 = vmatprep.subr.bf16.mxu1 %v691_v46  ;;  %v90_v44 = vld [vmem:[#allocation4 + $0x178] sm:$0xff]  ;;  %v684_v45 = vcombine.low %v77_v34, %v81_v35  ;;  %v686_v46 = vcombine.low %v78_v36, %v82_v37  ;;  %v701_v55 = vcombine.high %v93_v49, %v97_v50  ;;  %v101_v57 = vld [vmem:[#allocation4 + $0x1d0] sm:$0xff] }
  0x3c   :  { %v695_v48 = vcombine.high %v86_v43, %v90_v44  ;;  %v105_v58 = vld [vmem:[#allocation4 + $0x1f0] sm:$0xff] }
  0x3d   :  { %v709_v63 = vcombine.high %v101_v57, %v105_v58  ;;  %v708_v2 = vcombine.low %v101_v57, %v105_v58 }
  0x3e   :  { %438 = vmatpush1.bf16.msra.mxu0 %v688_v51  ;;  %479 = vmatpush1.bf16.msra.mxu1 %v690_v52  ;;  %v94_v51 = vld [vmem:[#allocation4 + $0x198] sm:$0xff] }
  0x3f   :  { %439 = vmatprep.subr.bf16.mxu0 %v697_v53  ;;  %480 = vmatprep.subr.bf16.mxu1 %v699_v54  ;;  %v98_v52 = vld [vmem:[#allocation4 + $0x1b8] sm:$0xff]  ;;  %v692_v53 = vcombine.low %v85_v41, %v89_v42  ;;  %v694_v54 = vcombine.low %v86_v43, %v90_v44 }
  0x40   :  { %v703_v56 = vcombine.high %v94_v51, %v98_v52 }
  0x42   :  { %440 = vmatpush1.bf16.msra.mxu0 %v696_v59  ;;  %481 = vmatpush1.bf16.msra.mxu1 %v698_v60  ;;  %v102_v59 = vld [vmem:[#allocation4 + $0x1d8] sm:$0xff] }
  0x43   :  { %441 = vmatprep.subr.bf16.mxu0 %v705_v61  ;;  %482 = vmatprep.subr.bf16.mxu1 %v707_v62  ;;  %v106_v60 = vld [vmem:[#allocation4 + $0x1f8] sm:$0xff]  ;;  %v700_v61 = vcombine.low %v93_v49, %v97_v50  ;;  %v702_v62 = vcombine.low %v94_v51, %v98_v52 }
  0x44   :  { %v711_v1 = vcombine.high %v102_v59, %v106_v60  ;;  %v710_v3 = vcombine.low %v102_v59, %v106_v60 }
  0x46   :  { %442 = vmatpush1.bf16.msra.mxu0 %v704_v4  ;;  %483 = vmatpush1.bf16.msra.mxu1 %v706_v6 }
  0x47   :  { %509 = vmatprep.subr.bf16.mxu0 %v653_v7  ;;  %550 = vmatprep.subr.bf16.mxu1 %v655_v8 }
  0x49   :  { %460 = vmatmul.mubr.bf16.vlgmr.msra.gmra.mrb[0].mxu0 %v828_v11  ;;  %501 = vmatmul.mubr.bf16.vlgmr.msra.gmra.mrb[0].mxu1 %v828_v11 }
  0x4a   :  { %510 = vmatpush1.bf16.msra.mxu0 %v652_v14  ;;  %551 = vmatpush1.bf16.msra.mxu1 %v654_v15 }
  0x4b   :  { %511 = vmatprep.subr.bf16.mxu0 %v661_v16  ;;  %552 = vmatprep.subr.bf16.mxu1 %v663_v17 }
  0x4c   :  { %541 = vmatprep.mubr.bf16.mxu0 %v770_v0  ;;  %582 = vmatprep.mubr.bf16.mxu1 %v770_v0  ;;  %v687_v0 = vcombine.high %v78_v36, %v82_v37 }
  0x4e   :  { %512 = vmatpush1.bf16.msra.mxu0 %v660_v22  ;;  %553 = vmatpush1.bf16.msra.mxu1 %v662_v23 }
  0x4f   :  { %513 = vmatprep.subr.bf16.mxu0 %v669_v24  ;;  %554 = vmatprep.subr.bf16.mxu1 %v671_v25 }
  0x52   :  { %514 = vmatpush1.bf16.msra.mxu0 %v668_v30  ;;  %555 = vmatpush1.bf16.msra.mxu1 %v670_v31 }
  0x53   :  { %515 = vmatprep.subr.bf16.mxu0 %v677_v32  ;;  %556 = vmatprep.subr.bf16.mxu1 %v679_v33 }
  0x56   :  { %516 = vmatpush1.bf16.msra.mxu0 %v676_v38  ;;  %557 = vmatpush1.bf16.msra.mxu1 %v678_v39 }
  0x57   :  { %517 = vmatprep.subr.bf16.mxu0 %v685_v40  ;;  %558 = vmatprep.subr.bf16.mxu1 %v687_v0  ;;  %v712_v40 = vld [vmem:[%s854_s2] ss:$0 sm:$0xff] }
  0x5a   :  { %518 = vmatpush1.bf16.msra.mxu0 %v684_v45  ;;  %559 = vmatpush1.bf16.msra.mxu1 %v686_v46 }
  0x5b   :  { %519 = vmatprep.subr.bf16.mxu0 %v693_v47  ;;  %560 = vmatprep.subr.bf16.mxu1 %v695_v48 }
  0x5e   :  { %520 = vmatpush1.bf16.msra.mxu0 %v692_v53  ;;  %561 = vmatpush1.bf16.msra.mxu1 %v694_v54 }
  0x5f   :  { %521 = vmatprep.subr.bf16.mxu0 %v701_v55  ;;  %562 = vmatprep.subr.bf16.mxu1 %v703_v56 }
  0x62   :  { %522 = vmatpush1.bf16.msra.mxu0 %v700_v61  ;;  %563 = vmatpush1.bf16.msra.mxu1 %v702_v62 }
  0x63   :  { %523 = vmatprep.subr.bf16.mxu0 %v709_v63  ;;  %564 = vmatprep.subr.bf16.mxu1 %v711_v1 }
  0x66   :  { %524 = vmatpush1.bf16.msra.mxu0 %v708_v2  ;;  %565 = vmatpush1.bf16.msra.mxu1 %v710_v3 }
  0x69   :  { %542 = vmatmul.mubr.bf16.vlgmr.msra.gmra.mrb[4].mxu0 %v828_v11  ;;  %583 = vmatmul.mubr.bf16.vlgmr.msra.gmra.mrb[4].mxu1 %v828_v11 }
 0x11c   :  { %v461_v4 = vpop.f32.mrb[0].mxu0  ;;  %v502_v7 = vpop.f32.mrb[0].mxu1 }
 0x11d   :  { %v463_v6 = vpop.f32.mrb[1].mxu0  ;;  %v591_v8 = vmul.f32 %v461_v4, %v824_v5  ;;  %v504_v10 = vpop.f32.mrb[1].mxu1  ;;  %v597_v12 = vmul.f32 %v502_v7, %v824_v5 }
 0x11e   :  { %v465_v9 = vpop.f32.mrb[2].mxu0  ;;  %v506_v14 = vpop.f32.mrb[2].mxu1  ;;  %v600_v15 = vmul.f32 %v504_v10, %v824_v5  ;;  %v594_v17 = vmul.f32 %v463_v6, %v824_v5 }
 0x11f   :  { %592 = vadd.xlane.f32.xlu0 %v591_v8  ;;  %v466_v13 = vpop.f32.mrb[3].mxu0  ;;  %598 = vadd.xlane.f32.xlu1 %v597_v12  ;;  %v507_v16 = vpop.f32.mrb[3].mxu1 }
 0x123   :  { %595 = vadd.xlane.f32.xlu0 %v594_v17  ;;  %601 = vadd.xlane.f32.xlu1 %v600_v15 }
 0x13c   :  { %v543_v11 = vpop.f32.mrb[4].mxu0  ;;  %v584_v20 = vpop.f32.mrb[4].mxu1 }
 0x13d   :  { %v603_v18 = vmul.f32 %v543_v11, %v824_v5  ;;  %v545_v19 = vpop.f32.mrb[5].mxu0  ;;  %v586_v23 = vpop.f32.mrb[5].mxu1  ;;  %v609_v24 = vmul.f32 %v584_v20, %v824_v5 }
 0x13e   :  { %v606_v21 = vmul.f32 %v545_v19, %v824_v5  ;;  %v547_v22 = vpop.f32.mrb[6].mxu0  ;;  %v588_v25 = vpop.f32.mrb[6].mxu1  ;;  %v612_v27 = vmul.f32 %v586_v23, %v824_v5 }
 0x13f   :  { %604 = vadd.xlane.f32.xlu0 %v603_v18  ;;  %v548_v26 = vpop.f32.mrb[7].mxu0  ;;  %v589_v28 = vpop.f32.mrb[7].mxu1 }
 0x140   :  { %607 = vadd.xlane.f32.xlu1 %v606_v21 }
 0x143   :  { %610 = vadd.xlane.f32.xlu0 %v609_v24 }
 0x144   :  { %613 = vadd.xlane.f32.xlu1 %v612_v27 }
 0x1ac   :  { %v593_v29 = vpop.xlane.xlu0 %592  ;;  %v599_v30 = vpop.xlane.xlu1 %598 }
 0x1b0   :  { %v596_v31 = vpop.xlane.xlu0 %595  ;;  %v602_v33 = vpop.xlane.xlu1 %601 }
 0x1b1   :  { %v616_v32 = vsel %vm615_vm0, %v593_v29, %v596_v31 }
 0x1b2   :  { %v618_v34 = vsel %vm617_vm1, %v616_v32, %v599_v30 }
 0x1b3   :  { %v620_v35 = vsel %vm619_vm2, %v618_v34, %v602_v33 }
 0x1cc   :  { %v605_v36 = vpop.xlane.xlu0 %604 }
 0x1cd   :  { %v622_v37 = vsel %vm621_vm3, %v620_v35, %v605_v36  ;;  %v608_v5 = vpop.xlane.xlu1 %607 }
 0x1ce   :  { %v624_v38 = vsel %vm623_vm4, %v622_v37, %v608_v5 }
 0x1d0   :  { %v611_v39 = vpop.xlane.xlu0 %610 }
 0x1d1   :  { %v626_v0 = vsel %vm625_vm5, %v624_v38, %v611_v39  ;;  %v614_v41 = vpop.xlane.xlu1 %613 }
 0x1d2   :  { %v628_v42 = vsel %vm627_vm6, %v626_v0, %v614_v41 }
 0x1d3   :  { %v636_v43 = vadd.f32 %v712_v40, %v628_v42 }
 0x1d5   :  { %v638_v44 = vsel %vm637_vm7, %v636_v43, inf }
 0x1d6   :  { %639 = vmin.xlane.f32.xlu0 %v638_v44 }
 0x263   :  { %v640_v45 = vpop.xlane.xlu0 %639 }
 0x264   :  { %641 = vst.msk [vmem:[%s855_s3] sm:$0xff] %vm615_vm0, %v640_v45 }
 0x265   :  { %646 = vsyncpa [#allocation3], 1 }
 0x266   :  { %647 = vsyncpa [#allocation5], 1 }

</bundles_post_ra>
